<compile_context>
chip_gen: v6e
topology: v6e:2x2x1
jax: 0.10.0
libtpu: 0.0.40
codegen_flags: <defaults>
</compile_context>

<pallas_src>
import functools

import jax
import jax.numpy as jnp
from jax import lax
from jax.experimental import pallas as pl
from jax.experimental.pallas import tpu as pltpu


def _pick_batch_block(n, c_in, l_in, c_out, l_out, itemsize,
                      max_block_bytes=4 << 20):
    """Largest divisor of n whose per-step tile fits `max_block_bytes` while
    leaving >= 2 grid steps (keeps both v7x TensorCores busy) when n >= 2."""
    row_bytes = itemsize * c_in * l_in + 4 * c_out * l_out
    cap = max(1, max_block_bytes // max(row_bytes, 1))
    best = 1
    for d in range(1, n + 1):
        if n % d:
            continue
        if d > cap:
            break
        if n >= 2 and n // d < 2:
            continue
        best = d
    return best


def _conv_stats_kernel(x_ref, w_ref, y_ref, stat_ref, *,
                       k_taps, dilation, stride, pad, l_out):
    """Conv1d over a block of batch rows + per-block BN partial statistics.

    x_ref:    (NB, C_in, L)       unpadded input rows (original dtype)
    w_ref:    (C_out, K*C_in)     tap-stacked weights (index = k*C_in + c)
    y_ref:    (NB, C_out, L_out)  conv output, time on the lane axis
    stat_ref: (C_out, 2)          [:,0] = per-channel sum over this block
                                  [:,1] = per-channel *centered* sum of squares
    """
    nb, c_in, _ = x_ref.shape
    span = (l_out - 1) * stride + 1

    # In-kernel halo: pad the lane axis inside VMEM (no HBM pad round trip).
    x = x_ref[...].astype(jnp.float32)
    if pad > 0:
        z = jnp.zeros((nb, c_in, pad), jnp.float32)
        xp = jnp.concatenate([z, x, z], axis=2)
    else:
        xp = x

    w = w_ref[...]
    for r in range(nb):  # nb is small and static: unrolled
        xr = xp[r]  # (C_in, L + 2*pad)
        # Stack the K shifted tap views along the contraction dim.  The per-tap
        # lane offsets / stride live on the XLU/vld slots and overlap the MXU.
        taps = [xr[:, k * dilation: k * dilation + span: stride]
                for k in range(k_taps)]
        xstk = jnp.concatenate(taps, axis=0) if k_taps > 1 else taps[0]
        # One (C_out, K*C_in) x (K*C_in, L_out) matmul per row (deep contraction).
        y_ref[r] = jnp.dot(w, xstk, preferred_element_type=jnp.float32)

    # BN partial statistics from the f32 conv tile (still resident in VMEM).
    acc = y_ref[...]                                       # (NB, C_out, L_out)
    cnt = jnp.float32(nb * l_out)
    s_rows = jnp.sum(acc, axis=2, keepdims=True)           # (NB, C_out, 1)
    s_tot = jnp.sum(s_rows, axis=0, keepdims=True)         # (1,  C_out, 1)
    d = acc - s_tot / cnt                                   # centered in-block
    m_rows = jnp.sum(d * d, axis=2, keepdims=True)
    m_tot = jnp.sum(m_rows, axis=0, keepdims=True)          # (1,  C_out, 1)
    stat_ref[...] = jnp.concatenate([s_tot[0], m_tot[0]], axis=1)   # (C_out, 2)


def _bn_apply_kernel(y_ref, ss_ref, o_ref):
    """out = y * scale + shift  with per-channel scale/shift packed in ss."""
    scale = ss_ref[:, 0:1]    # (C_out, 1) -> broadcasts over (NB, C_out, L_out)
    shift = ss_ref[:, 1:2]
    o_ref[...] = y_ref[...] * scale + shift


def temporal_conv(x, weight, bias, gamma, beta, *, stride=1, dilation=1,
                  eps=1e-5):
    """Forward of TemporalConv (training-mode BN). x: (N, C_in, L)."""
    # Conv bias is exactly cancelled by training-mode BN mean subtraction; it
    # would be dead DMA/VALU work.  (Do NOT reuse this for eval-mode BN.)
    del bias
    n, c_in, length = x.shape
    c_out, _, k = weight.shape
    pad = (k + (k - 1) * (dilation - 1) - 1) // 2
    l_out = (length + 2 * pad - dilation * (k - 1) - 1) // stride + 1

    # Tap-stacked weights: (C_out, K*C_in), index = k*C_in + c.
    w_stk = jnp.transpose(weight.astype(jnp.float32), (0, 2, 1)).reshape(
        c_out, k * c_in)

    nb = _pick_batch_block(n, c_in, length, c_out, l_out, x.dtype.itemsize)
    n_blocks = n // nb

    flops = 2 * n * c_out * l_out * c_in * k
    bytes_accessed = (x.dtype.itemsize * n * c_in * length
                      + 4 * c_out * k * c_in
                      + 4 * n * c_out * l_out
                      + 4 * n_blocks * c_out * 2)

    # ---- pass 1: conv + per-block BN partial statistics --------------------
    y, stats = pl.pallas_call(
        functools.partial(_conv_stats_kernel, k_taps=k, dilation=dilation,
                          stride=stride, pad=pad, l_out=l_out),
        out_shape=(
            jax.ShapeDtypeStruct((n, c_out, l_out), jnp.float32),
            jax.ShapeDtypeStruct((n_blocks, c_out, 2), jnp.float32),
        ),
        grid=(n_blocks,),
        in_specs=[
            pl.BlockSpec((nb, c_in, length), lambda i: (i, 0, 0)),
            pl.BlockSpec((c_out, k * c_in), lambda i: (0, 0)),
        ],
        out_specs=(
            pl.BlockSpec((nb, c_out, l_out), lambda i: (i, 0, 0)),
            pl.BlockSpec((None, c_out, 2), lambda i: (i, 0, 0)),
        ),
        compiler_params=pltpu.CompilerParams(
            dimension_semantics=("parallel",),
            vmem_limit_bytes=32 * 1024 * 1024),
        cost_estimate=pl.CostEstimate(flops=flops, transcendentals=0,
                                      bytes_accessed=bytes_accessed),
    )(x, w_stk)

    # ---- tiny per-channel finalize: Chan combine of per-block stats --------
    cnt_blk = jnp.float32(nb * l_out)
    cnt_tot = jnp.float32(n * l_out)
    sums = stats[:, :, 0]                      # (n_blocks, C_out)
    m2s = stats[:, :, 1]
    mean = jnp.sum(sums, axis=0) / cnt_tot
    blk_mean = sums / cnt_blk
    var = (jnp.sum(m2s, axis=0)
           + cnt_blk * jnp.sum((blk_mean - mean[None, :]) ** 2, axis=0)
           ) / cnt_tot                          # biased variance (PyTorch BN)
    rstd = lax.rsqrt(var + eps)
    scale = gamma.astype(jnp.float32) * rstd
    shift = beta.astype(jnp.float32) - mean * scale
    ss = jnp.stack([scale, shift], axis=1)      # (C_out, 2)

    # ---- pass 2: apply normalization in place (aliases the conv output) ----
    out = pl.pallas_call(
        _bn_apply_kernel,
        out_shape=jax.ShapeDtypeStruct((n, c_out, l_out), jnp.float32),
        grid=(n_blocks,),
        in_specs=[
            pl.BlockSpec((nb, c_out, l_out), lambda i: (i, 0, 0)),
            pl.BlockSpec((c_out, 2), lambda i: (0, 0)),
        ],
        out_specs=pl.BlockSpec((nb, c_out, l_out), lambda i: (i, 0, 0)),
        input_output_aliases={0: 0},
        compiler_params=pltpu.CompilerParams(
            dimension_semantics=("parallel",),
            vmem_limit_bytes=32 * 1024 * 1024),
    )(y, ss)

    # Output is already (N, C_out, L_out) == PyTorch NCL layout.
    return out


def _reference(x, weight, bias, gamma, beta, *, stride, dilation, eps=1e-5):
    k = weight.shape[-1]
    pad = (k + (k - 1) * (dilation - 1) - 1) // 2
    y = jax.lax.conv_general_dilated(
        x, weight, window_strides=(stride,), padding=[(pad, pad)],
        rhs_dilation=(dilation,), dimension_numbers=("NCH", "OIH", "NCH"))
    y = y + bias[None, :, None]
    mean = jnp.mean(y, axis=(0, 2), keepdims=True)
    var = jnp.mean((y - mean) ** 2, axis=(0, 2), keepdims=True)
    return ((y - mean) / jnp.sqrt(var + eps) * gamma[None, :, None]
            + beta[None, :, None])


if __name__ == "__main__":
    # Small shapes consistent with the module: N=2, C_in=4, C_out=8, L=16, K=3.
    N, C_IN, C_OUT, L, K = 2, 4, 8, 16, 3
    STRIDE, DILATION = 1, 2

    key = jax.random.PRNGKey(0)
    kx, kw, kb, kg, kbeta = jax.random.split(key, 5)

    x = jax.random.normal(kx, (N, C_IN, L), dtype=jnp.float32)

    # Deterministic PyTorch-like init: Conv1d weight/bias ~ U(-b, b), b = 1/sqrt(C_in*K).
    bound = 1.0 / jnp.sqrt(jnp.float32(C_IN * K))
    weight = jax.random.uniform(kw, (C_OUT, C_IN, K), jnp.float32, -bound, bound)
    bias = jax.random.uniform(kb, (C_OUT,), jnp.float32, -bound, bound)
    gamma = jax.random.uniform(kg, (C_OUT,), jnp.float32, 0.5, 1.5)
    beta = jax.random.uniform(kbeta, (C_OUT,), jnp.float32, -0.5, 0.5)

    fwd = jax.jit(functools.partial(temporal_conv, stride=STRIDE,
                                    dilation=DILATION))
    out = jax.block_until_ready(fwd(x, weight, bias, gamma, beta))

    ref = _reference(x, weight, bias, gamma, beta, stride=STRIDE,
                     dilation=DILATION)
    assert out.shape == ref.shape, (out.shape, ref.shape)
    assert jnp.allclose(out, ref, atol=2e-4, rtol=2e-4), "mismatch vs JAX reference"

    print("KERNEL_OK")
</pallas_src>

<mosaic_0001>
module attributes {stable_mosaic.version = 11 : i64} {
  func.func @_conv_stats_kernel(%arg0: i32, %arg1: memref<1x4x16xf32, #tpu.memory_space<vmem>>, %arg2: memref<8x12xf32, #tpu.memory_space<vmem>>, %arg3: memref<1x8x16xf32, #tpu.memory_space<vmem>>, %arg4: memref<1x8x2xf32, #tpu.memory_space<vmem>>) attributes {dimension_semantics = [#tpu.dimension_semantics<parallel>], iteration_bounds = array<i64: 2>, scalar_prefetch = 0 : i64, scratch_operands = 0 : i64, tpu.core_type = #tpu.core_type<tc>, window_params = [{transform_indices = @transform_0, window_bounds = array<i64: 1, 4, 16>}, {pipeline_mode = #tpu.pipeline_mode<synchronous>, transform_indices = @transform_1, window_bounds = array<i64: 8, 12>}, {transform_indices = @transform_2, window_bounds = array<i64: 1, 8, 16>}, {transform_indices = @transform_3, window_bounds = array<i64: 1, 8, 2>}]} {
    %c0 = arith.constant 0 : index
    %c0_0 = arith.constant 0 : index
    %c0_1 = arith.constant 0 : index
    %0 = vector.load %arg1[%c0, %c0_0, %c0_1] : memref<1x4x16xf32, #tpu.memory_space<vmem>>, vector<1x4x16xf32>
    %cst = arith.constant 0.000000e+00 : f32
    %1 = vector.broadcast %cst : f32 to vector<1x4x2xf32>
    %2 = tpu.concatenate %1, %0, %1 in 2 : vector<1x4x2xf32>, vector<1x4x16xf32>, vector<1x4x2xf32> -> vector<1x4x20xf32>
    %c0_2 = arith.constant 0 : index
    %c0_3 = arith.constant 0 : index
    %3 = vector.load %arg2[%c0_2, %c0_3] : memref<8x12xf32, #tpu.memory_space<vmem>>, vector<8x12xf32>
    %4 = vector.shape_cast %2 : vector<1x4x20xf32> to vector<4x20xf32>
    %5 = vector.extract_strided_slice %4 {offsets = [0, 0], sizes = [4, 16], strides = [1, 1]} : vector<4x20xf32> to vector<4x16xf32>
    %6 = vector.extract_strided_slice %4 {offsets = [0, 2], sizes = [4, 16], strides = [1, 1]} : vector<4x20xf32> to vector<4x16xf32>
    %7 = vector.extract_strided_slice %4 {offsets = [0, 4], sizes = [4, 16], strides = [1, 1]} : vector<4x20xf32> to vector<4x16xf32>
    %8 = tpu.concatenate %5, %6, %7 in 0 : vector<4x16xf32>, vector<4x16xf32>, vector<4x16xf32> -> vector<12x16xf32>
    %cst_4 = arith.constant dense<0.000000e+00> : vector<8x16xf32>
    %9 = tpu.matmul %3, %8, %cst_4 {dimension_numbers = #tpu.dot_dimension_numbers<[1], [0], [0], [1], [0, 0, 1, 1], [], []>} : vector<8x12xf32>, vector<12x16xf32>, vector<8x16xf32> -> vector<8x16xf32>
    %c0_5 = arith.constant 0 : index
    %c0_6 = arith.constant 0 : index
    %c0_7 = arith.constant 0 : index
    %10 = vector.load %arg3[%c0_5, %c0_6, %c0_7] : memref<1x8x16xf32, #tpu.memory_space<vmem>>, vector<1x8x16xf32>
    %11 = vector.shape_cast %10 : vector<1x8x16xf32> to vector<8x16xf32>
    %12 = vector.shape_cast %9 : vector<8x16xf32> to vector<1x8x16xf32>
    tpu.vector_store %arg3[%c0_5, %c0_6, %c0_7], %12 {strides = array<i32>} : memref<1x8x16xf32, #tpu.memory_space<vmem>>, vector<1x8x16xf32>,
    %c0_8 = arith.constant 0 : index
    %c0_9 = arith.constant 0 : index
    %c0_10 = arith.constant 0 : index
    %13 = vector.load %arg3[%c0_8, %c0_9, %c0_10] : memref<1x8x16xf32, #tpu.memory_space<vmem>>, vector<1x8x16xf32>
    %cst_11 = arith.constant dense<0.000000e+00> : vector<1x8xf32>
    %14 = vector.multi_reduction <add>, %13, %cst_11 [2] : vector<1x8x16xf32> to vector<1x8xf32>
    %15 = vector.shape_cast %14 : vector<1x8xf32> to vector<1x8x1xf32>
    %cst_12 = arith.constant dense<0.000000e+00> : vector<8x1xf32>
    %16 = vector.multi_reduction <add>, %15, %cst_12 [0] : vector<1x8x1xf32> to vector<8x1xf32>
    %17 = vector.shape_cast %16 : vector<8x1xf32> to vector<1x8x1xf32>
    %cst_13 = arith.constant 1.600000e+01 : f32
    %18 = vector.broadcast %cst_13 : f32 to vector<1x8x1xf32>
    %19 = arith.divf %17, %18 : vector<1x8x1xf32>
    %20 = vector.broadcast %19 : vector<1x8x1xf32> to vector<1x8x16xf32>
    %21 = arith.subf %13, %20 : vector<1x8x16xf32>
    %22 = arith.mulf %21, %21 : vector<1x8x16xf32>
    %cst_14 = arith.constant dense<0.000000e+00> : vector<1x8xf32>
    %23 = vector.multi_reduction <add>, %22, %cst_14 [2] : vector<1x8x16xf32> to vector<1x8xf32>
    %24 = vector.shape_cast %23 : vector<1x8xf32> to vector<1x8x1xf32>
    %cst_15 = arith.constant dense<0.000000e+00> : vector<8x1xf32>
    %25 = vector.multi_reduction <add>, %24, %cst_15 [0] : vector<1x8x1xf32> to vector<8x1xf32>
    %26 = vector.shape_cast %25 : vector<8x1xf32> to vector<1x8x1xf32>
    %27 = vector.shape_cast %17 : vector<1x8x1xf32> to vector<8x1xf32>
    %28 = vector.shape_cast %26 : vector<1x8x1xf32> to vector<8x1xf32>
    %29 = tpu.concatenate %27, %28 in 1 : vector<8x1xf32>, vector<8x1xf32> -> vector<8x2xf32>
    %c0_16 = arith.constant 0 : index
    %c0_17 = arith.constant 0 : index
    %c0_18 = arith.constant 0 : index
    %30 = vector.load %arg4[%c0_16, %c0_17, %c0_18] : memref<1x8x2xf32, #tpu.memory_space<vmem>>, vector<1x8x2xf32>
    %31 = vector.shape_cast %30 : vector<1x8x2xf32> to vector<8x2xf32>
    %32 = vector.shape_cast %29 : vector<8x2xf32> to vector<1x8x2xf32>
    tpu.vector_store %arg4[%c0_16, %c0_17, %c0_18], %32 {strides = array<i32>} : memref<1x8x2xf32, #tpu.memory_space<vmem>>, vector<1x8x2xf32>,
    return
  }
  func.func @transform_0(%arg0: i32) -> (i32, i32, i32) {
    %c0_i32 = arith.constant 0 : i32
    %c0_i32_0 = arith.constant 0 : i32
    %c0_i32_1 = arith.constant 0 : i32
    return %arg0, %c0_i32, %c0_i32_0 : i32, i32, i32
  }
  func.func @transform_1(%arg0: i32) -> (i32, i32) {
    %c0_i32 = arith.constant 0 : i32
    %c0_i32_0 = arith.constant 0 : i32
    %c0_i32_1 = arith.constant 0 : i32
    return %c0_i32, %c0_i32_0 : i32, i32
  }
  func.func @transform_2(%arg0: i32) -> (i32, i32, i32) {
    %c0_i32 = arith.constant 0 : i32
    %c0_i32_0 = arith.constant 0 : i32
    %c0_i32_1 = arith.constant 0 : i32
    return %arg0, %c0_i32, %c0_i32_0 : i32, i32, i32
  }
  func.func @transform_3(%arg0: i32) -> (i32, i32, i32) {
    %c0_i32 = arith.constant 0 : i32
    %c0_i32_0 = arith.constant 0 : i32
    %c0_i32_1 = arith.constant 0 : i32
    return %arg0, %c0_i32, %c0_i32_0 : i32, i32, i32
  }
}

module attributes {stable_mosaic.version = 11 : i64} {
  func.func @_bn_apply_kernel(%arg0: i32, %arg1: memref<1x8x16xf32, #tpu.memory_space<vmem>>, %arg2: memref<8x2xf32, #tpu.memory_space<vmem>>, %arg3: memref<1x8x16xf32, #tpu.memory_space<vmem>>) attributes {dimension_semantics = [#tpu.dimension_semantics<parallel>], iteration_bounds = array<i64: 2>, scalar_prefetch = 0 : i64, scratch_operands = 0 : i64, tpu.core_type = #tpu.core_type<tc>, window_params = [{transform_indices = @transform_0, window_bounds = array<i64: 1, 8, 16>}, {pipeline_mode = #tpu.pipeline_mode<synchronous>, transform_indices = @transform_1, window_bounds = array<i64: 8, 2>}, {transform_indices = @transform_2, window_bounds = array<i64: 1, 8, 16>}]} {
    %c0 = arith.constant 0 : index
    %c0_0 = arith.constant 0 : index
    %0 = vector.load %arg2[%c0, %c0_0] : memref<8x2xf32, #tpu.memory_space<vmem>>, vector<8x1xf32>
    %c0_1 = arith.constant 0 : index
    %c1 = arith.constant 1 : index
    %1 = vector.load %arg2[%c0_1, %c1] : memref<8x2xf32, #tpu.memory_space<vmem>>, vector<8x1xf32>
    %c0_2 = arith.constant 0 : index
    %c0_3 = arith.constant 0 : index
    %c0_4 = arith.constant 0 : index
    %2 = vector.load %arg1[%c0_2, %c0_3, %c0_4] : memref<1x8x16xf32, #tpu.memory_space<vmem>>, vector<1x8x16xf32>
    %3 = vector.shape_cast %0 : vector<8x1xf32> to vector<1x8x1xf32>
    %4 = vector.broadcast %3 : vector<1x8x1xf32> to vector<1x8x16xf32>
    %5 = arith.mulf %2, %4 : vector<1x8x16xf32>
    %6 = vector.shape_cast %1 : vector<8x1xf32> to vector<1x8x1xf32>
    %7 = vector.broadcast %6 : vector<1x8x1xf32> to vector<1x8x16xf32>
    %8 = arith.addf %5, %7 : vector<1x8x16xf32>
    %c0_5 = arith.constant 0 : index
    %c0_6 = arith.constant 0 : index
    %c0_7 = arith.constant 0 : index
    %9 = vector.load %arg3[%c0_5, %c0_6, %c0_7] : memref<1x8x16xf32, #tpu.memory_space<vmem>>, vector<1x8x16xf32>
    tpu.vector_store %arg3[%c0_5, %c0_6, %c0_7], %8 {strides = array<i32>} : memref<1x8x16xf32, #tpu.memory_space<vmem>>, vector<1x8x16xf32>,
    return
  }
  func.func @transform_0(%arg0: i32) -> (i32, i32, i32) {
    %c0_i32 = arith.constant 0 : i32
    %c0_i32_0 = arith.constant 0 : i32
    %c0_i32_1 = arith.constant 0 : i32
    return %arg0, %c0_i32, %c0_i32_0 : i32, i32, i32
  }
  func.func @transform_1(%arg0: i32) -> (i32, i32) {
    %c0_i32 = arith.constant 0 : i32
    %c0_i32_0 = arith.constant 0 : i32
    %c0_i32_1 = arith.constant 0 : i32
    return %c0_i32, %c0_i32_0 : i32, i32
  }
  func.func @transform_2(%arg0: i32) -> (i32, i32, i32) {
    %c0_i32 = arith.constant 0 : i32
    %c0_i32_0 = arith.constant 0 : i32
    %c0_i32_1 = arith.constant 0 : i32
    return %arg0, %c0_i32, %c0_i32_0 : i32, i32, i32
  }
}

</mosaic_0001>

<bundles_post_ra>
// kernel: temporal_conv.3
= control target key start
LH: loop header
LB: loop body
LE: loop exit
PB: predicated region body
PF: predicated region fallthrough
CT: control target
= control target key end

     0   :  { %7 = vsyncpa [#allocation3], 0  ;;  %s577_s0 = inlined_call_operand.hbm [shape: f32[2,8,16], index: 0, kind: input, shape index: {}, may-alias: {0,2}]   ;;  %s578_s1 = inlined_call_operand.vmem [shape: f32[8,2], index: 1, kind: input, shape index: {}]   ;;  %s579_s2 = inlined_call_operand.hbm [shape: f32[2,8,16], index: 2, kind: output, shape index: {}, may-alias: {0,2}]  }
   0x1   :  { %9 = vsyncpa [#allocation3 + $0x1], 0 }
   0x2   :  { %10 = vsyncpa [#allocation4], 0 }
   0x3   :  { %12 = vsyncpa [#allocation4 + $0x1], 0  ;;  %s433_s9 = smov 0   ;;  %s435_s10 = smov 0  }
   0x4   :  { %s437_s11 = smov 0   ;;  %s439_s12 = smov 0  }
   0x5 LB: > { %s454_s13 = sadd.s32 4294967295, %s412_s12   ;;  %s258_s14 = sadd.s32 4294967294, %s412_s12   ;;  %s412_s12 = sphi %s439_s12, %s596_s12   ;;  %s408_s11 = sphi %s437_s11, %s595_s11   ;;  %s404_s10 = sphi %s435_s10, %s594_s10   ;;  %s400_s9 = sphi %s433_s9, %s593_s9  }
   0x6   : > { %s458_s15 = sadd.s32 1, %s412_s12   ;;  %s25_s16 = sadd.s32 1, %s408_s11 }
   0x7   : > { %s22_s17 = ssub.s32 %s412_s12, %s458_s15  ;;  %p32_p0 = scmp.ne.s32.totalorder %s408_s11, %s404_s10 }
   0x8   : > { %p23_p1 = scmp.eq.s32.totalorder %s22_s17, 0  ;;  %p33_p2 = scmp.eq.s32.totalorder %s412_s12, 0 }
   0x9   : > { %p38_p3 = scmp.ne.s32.totalorder %s404_s10, %s400_s9  ;;  %p39_p4 = scmp.eq.s32.totalorder %s454_s13, 0 }
   0xa   : > { %s470_s18 = scalar_select %p23_p1, %s408_s11, %s25_s16  }
   0xb   : > { %p472_p5 = por %p33_p2, %p32_p0  ;;  %p476_p6 = por %p39_p4, %p38_p3 }
   0xc   : > { %p83_p7 = scmp.eq.s32.totalorder %s454_s13, 1  ;;  %p89_p8 = scmp.eq.s32.totalorder %s258_s14, 1 }
   0xd   : > { %s583_s20 = scalar_select %p476_p6, 1, 0 }
   0xe   : > { %p282_p10 = scmp.lt.s32.totalorder %s412_s12, 2  ;;  %p483_p11 = por %p83_p7, %p32_p0 }
   0xf   : > { %p487_p12 = por %p89_p8, %p38_p3  ;;  %s112_s23 = sand.u32 1, %s408_s11  }
  0x10   : > { %s584_s21 = scalar_select %p483_p11, 1, 0 }
  0x11   : > { %s585_s22 = scalar_select %p487_p12, 1, 0 }
  0x12   : > { %s262_s24 = sshll.u32 %s412_s12, 7  ;;  %s261_s25 = sshll.u32 %s112_s23, 3 }
  0x13   : > { %s496_s28 = scalar_lea.hbm %s577_s0, %s262_s24  ;;  %s116_s29 = scalar_lea.vmem [#allocation2], %s261_s25 }
  0x14   : > { %s123_s30 = sshll.u32 %s116_s29, 4  ;;  %p500_p13 = pnand %p282_p10, %p472_p5  ;;  %s504_s30 = int_to_ptr.vmem [resolvable:$true] %s123_s30 }
  0x15   : > { %s113_s4 = scalar_lea.sflag [#allocation3], %s112_s23  ;;  %s320_s5 = scalar_lea.hbm %s496_s28, 128 }
  0x16   : > { %p321_p2 = scmp.ne.s32.totalorder %s496_s28, %s320_s5  ;;  %p322_p3 = pneg %p500_p13 }
  0x17   : > { %s325_s8 = scalar_lea.hbm %s577_s0, 256  ;;  %p326_p5 = scmp.lt.s32.totalorder %s496_s28, %s577_s0 }
  0x18   : > { %p323_p4 = pnand %p322_p3, %p321_p2  ;;  %p327_p8 = scmp.lt.s32.totalorder %s325_s8, %s320_s5 }
  0x1a   : > { %p324_p7 = pneg %p323_p4  ;;  %p328_p10 = por %p327_p8, %p326_p5 }
  0x1c   : > { %p329_p9 = pnand %p328_p10, %p324_p7 }
  0x1e   : > { %332 = shalt.err (!%p329_p9)
}
  0x1f   : > { %s333_s17 = scalar_lea.vmem %s504_s30, 128  ;;  %s414_s19 = smov [#allocation2]  }
  0x20   : > { %p334_p0 = scmp.ne.s32.totalorder %s504_s30, %s333_s17  ;;  %s338_s23 = sshll.u32 %s414_s19, 4  ;;  %s339_s23 = int_to_ptr.vmem [resolvable:$false] %s338_s23 }
  0x21   : > { %s340_s24 = scalar_lea.vmem %s339_s23, 256  ;;  %p341_p4 = scmp.lt.s32.totalorder %s504_s30, %s339_s23 }
  0x22   : > { %p336_p1 = pnand %p334_p0, %p322_p3  ;;  %p342_p12 = scmp.lt.s32.totalorder %s340_s24, %s333_s17 }
  0x24   : > { %p337_p2 = pneg %p336_p1  ;;  %p343_p11 = por %p342_p12, %p341_p4 }
  0x26   : > { %p344_p6 = pnand %p343_p11, %p337_p2 }
  0x28   : > { %347 = shalt.err (!%p344_p6)
}
  0x29   : > { %277 = dma.hbm_to_vmem [thread:$0]  (!%p500_p13), %s496_s28, 128, %s504_s30, %s113_s4  }
  0x2a   : > { %p587_p9 = scmp.lt.s32.totalorder %s412_s12, 3  ;;  %p588_p7 = scmp.ge.s32.totalorder %s412_s12, 1 }
  0x2c   : > { %p129_p0 = pnand %p588_p7, %p587_p9 }
  0x2d   : > { %s531_s25 = sand.u32 (!%p129_p0), 1, %s404_s10   ;;  %p589_p6 = scmp.ne.s32.totalorder (!%p129_p0), %s583_s20, 0 }
  0x2e   : > { %132 = sbr.rel (%p129_p0) target bundleno = 198 (0xc6), region = 28  ;;  %s264_s26 = sshll.u32 (!%p129_p0), %s531_s25, 3 }
  0x2f   : > { %s135_s27 = scalar_lea.sflag (!%p129_p0), [#allocation3], %s531_s25  ;;  %s138_s29 = scalar_lea.vmem (!%p129_p0), [#allocation2], %s264_s26 }
  0x33   : > { %391 = dma.done.wait (%p589_p6), %s135_s27, 128  }
  0x34   : > { %393 = vsyncadd (%p589_p6), %s135_s27, 4294967168  ;;  %v415_v0 = vmov 0   ;;  %v159_v1 = vld [vmem:[%s578_s1] sm:$0xff]  ;;  %v416_v2 = vmov 1   ;;  %s267_s3 = sshll.u32 %s454_s13, 7  ;;  %s158_s4 = scalar_lea.vmem [#allocation5], %s264_s26 }
  0x35   : > { %318 = vset.pattern.permute.xlu0 %v415_v0  ;;  %v160_v4 = vld [vmem:[%s138_s29] sm:$0xff]  ;;  %s188_s5 = sshll.u32 %s158_s4, 4  ;;  %vm172_vm0 = vcmask 130048   ;;  %s186_s7 = scalar_lea.hbm %s579_s2, %s267_s3  ;;  %s189_s5 = int_to_ptr.vmem [resolvable:$true] %s188_s5 }
  0x36   : > { %163 = vperm.xlu0 %318, %v159_v1   ;;  %s175_s8 = scalar_lea.sflag [#allocation4], %s531_s25  ;;  %s348_s14 = scalar_lea.vmem %s189_s5, 128 }
  0x37   : > { %p349_p11 = scmp.ne.s32.totalorder %s189_s5, %s348_s14  ;;  %p590_p12 = scmp.ne.s32.totalorder %s584_s21, 0 }
  0x38   : > { %s417_s16 = smov [#allocation5]  }
  0x39   : > { %p350_p13 = pnand %p349_p11, %p590_p12  ;;  %s352_s13 = sshll.u32 %s417_s16, 4  ;;  %s353_s13 = int_to_ptr.vmem [resolvable:$false] %s352_s13 }
  0x3a   : > { %319 = vset.pattern.permute.xlu0 %v416_v2  ;;  %s354_s17 = scalar_lea.vmem %s353_s13, 256  ;;  %p355_p3 = scmp.lt.s32.totalorder %s189_s5, %s353_s13 }
  0x3b   : > { %168 = vperm.xlu0 %319, %v159_v1   ;;  %p351_p1 = pneg %p350_p13  ;;  %p356_p5 = scmp.lt.s32.totalorder %s354_s17, %s348_s14 }
  0x3d   : > { %p357_p8 = por %p356_p5, %p355_p3 }
  0x3f   : > { %p358_p10 = pnand %p357_p8, %p351_p1 }
  0xb1   : > { %v164_v3 = vpop.permute.xlu0 %163 }
  0xb2   : > { %v166_v5 = vmul.f32 %v164_v3, %v160_v4 }
  0xb6   : > { %v169_v6 = vpop.permute.xlu0 %168 }
  0xb7   : > { %v171_v7 = vadd.f32 %v169_v6, %v166_v5 }
  0xb9   : > { %173 = vst.msk [vmem:[%s158_s4] sm:$0xff] %vm172_vm0, %v171_v7 }
  0xba   : > { %361 = shalt.err (!%p358_p10)
}
  0xbb   : > { %s362_s19 = scalar_lea.hbm %s186_s7, 128  ;;  %s366_s25 = scalar_lea.hbm %s579_s2, 256 }
  0xbc   : > { %p363_p2 = scmp.ne.s32.totalorder %s186_s7, %s362_s19  ;;  %p367_p7 = scmp.lt.s32.totalorder %s186_s7, %s579_s2 }
  0xbd   : > { %p368_p0 = scmp.lt.s32.totalorder %s366_s25, %s362_s19 }
  0xbe   : > { %p364_p4 = pnand %p363_p2, %p590_p12 }
  0xbf   : > { %p369_p6 = por %p368_p0, %p367_p7 }
  0xc0   : > { %p365_p9 = pneg %p364_p4 }
  0xc2   : > { %p370_p11 = pnand %p369_p6, %p365_p9 }
  0xc4   : > { %373 = shalt.err (!%p370_p11)
}
  0xc5   : > { %272 = dma.vmem_to_hbm [thread:$0]  (%p590_p12), %s189_s5, 128, %s186_s7, %s175_s8  }
  0xc6 PF: > { %s200_s29 = sand.u32 1, %s400_s9   ;;  %p591_p13 = scmp.ne.s32.totalorder %s585_s22, 0 }
  0xc7   : > { %p592_p1 = scmp.ge.s32.totalorder %s412_s12, 2  ;;  %s201_s28 = scalar_lea.sflag [#allocation4], %s200_s29 }
  0xc9   : > { %p279_p3 = pnand %p592_p1, %p591_p13 }
  0xcb   : > { %p280_p5 = pneg %p279_p3 }
  0xcd   : > { %395 = dma.done.wait (%p280_p5), %s201_s28, 128  }
  0xce   : > { %397 = vsyncadd (%p280_p5), %s201_s28, 4294967168  ;;  %p15_p8 = scmp.ge.s32.totalorder %s458_s15, 4   ;;  %s593_s9 = smov %s404_s10 }
  0xcf   : > { %s594_s10 = smov %s408_s11  ;;  %s595_s11 = smov %s470_s18 }
  0xd0   : > { %s596_s12 = smov %s458_s15  ;;  %17 = sbr.rel (!%p15_p8) target bundleno = 5 (0x5), region = 73 }
  0xd5   :  { %206 = vsyncpa [#allocation3], 1 }
  0xd6   :  { %208 = vsyncpa [#allocation3 + $0x1], 1 }
  0xd7   :  { %209 = vsyncpa [#allocation4], 1 }
  0xd8   :  { %211 = vsyncpa [#allocation4 + $0x1], 1 }

// kernel: temporal_conv.2
= control target key start
LH: loop header
LB: loop body
LE: loop exit
PB: predicated region body
PF: predicated region fallthrough
CT: control target
= control target key end

     0   :  { %9 = vsyncpa [#allocation3], 0  ;;  %s648_s0 = inlined_call_operand.vmem [shape: f32[2,4,16], index: 0, kind: input, shape index: {}]   ;;  %s649_s1 = inlined_call_operand.vmem [shape: f32[8,12], index: 1, kind: input, shape index: {}]   ;;  %s650_s2 = inlined_call_operand.hbm [shape: f32[2,8,16], index: 2, kind: output, shape index: {0}]   ;;  %s651_s3 = inlined_call_operand.vmem [shape: f32[2,8,2], index: 3, kind: output, shape index: {1}]  }
   0x1   :  { %11 = vsyncpa [#allocation3 + $0x1], 0  ;;  %s549_s12 = smov 0   ;;  %s551_s13 = smov 0  }
   0x2   :  { %s553_s14 = smov 0   ;;  %s555_s15 = smov 0  }
   0x3 LB: > { %s570_s16 = sadd.s32 4294967295, %s521_s15   ;;  %s394_s17 = sadd.s32 4294967294, %s521_s15   ;;  %s521_s15 = sphi %s555_s15, %s657_s15   ;;  %s517_s14 = sphi %s553_s14, %s656_s14   ;;  %s513_s13 = sphi %s551_s13, %s655_s13   ;;  %s509_s12 = sphi %s549_s12, %s654_s12  }
   0x4   : > { %s574_s18 = sadd.s32 1, %s521_s15   ;;  %s71_s19 = sadd.s32 1, %s517_s14 }
   0x5   : > { %s68_s20 = ssub.s32 %s521_s15, %s574_s18  ;;  %p81_p0 = scmp.ne.s32.totalorder %s517_s14, %s513_s13 }
   0x6   : > { %p69_p1 = scmp.eq.s32.totalorder %s68_s20, 0  ;;  %p82_p2 = scmp.eq.s32.totalorder %s570_s16, 1 }
   0x7   : > { %p87_p3 = scmp.ne.s32.totalorder %s513_s13, %s509_s12  ;;  %p88_p4 = scmp.eq.s32.totalorder %s394_s17, 1 }
   0x8   : > { %s585_s21 = scalar_select %p69_p1, %s517_s14, %s71_s19  }
   0x9   : > { %p587_p5 = por %p82_p2, %p81_p0  ;;  %p591_p6 = por %p88_p4, %p87_p3 }
   0xa   : > { %p397_p7 = scmp.ge.s32.totalorder %s521_s15, 1  ;;  %p142_p8 = scmp.lt.s32.totalorder %s521_s15, 3 }
   0xc   : > { %p143_p9 = pnand %p397_p7, %p142_p8 }
   0xd   : > { %p169_p10 = scmp.lt.s32.totalorder (!%p143_p9), %s570_s16, 1  ;;  %s524_s29 = smov (!%p143_p9), 2  }
   0xe   : > { %146 = sbr.rel (%p143_p9) target bundleno = 747 (0x2eb), region = 28  ;;  %s526_s30 = smov (!%p143_p9), 124  }
   0xf   : > { %s527_s4 = smov (!%p143_p9), 126   ;;  %s160_s7 = sand.u32 (!%p143_p9), 1, %s513_s13  }
  0x10   : > { %s398_s8 = sshll.u32 (!%p143_p9), %s160_s7, 3  ;;  %s404_s10 = sshll.u32 (!%p143_p9), %s570_s16, 7 }
  0x11   : > { %s162_s9 = scalar_lea.vmem (!%p143_p9), [#allocation2], %s398_s8  ;;  %s306_s20 = scalar_lea.hbm (!%p143_p9), %s650_s2, %s404_s10 }
  0x12   : > { %s308_s11 = sshll.u32 (!%p143_p9), %s162_s9, 4  ;;  %s528_s27 = smov (!%p143_p9), [#allocation2]   ;;  %s309_s11 = int_to_ptr.vmem [resolvable:$true] %s308_s11 }
  0x13   : > { %v523_v0 = vmov 0.0   ;;  %s599_s24 = scalar_select %p169_p10, %s570_s16, 1  ;;  %vm525_vm0 = vmmov 0   ;;  %vm182_vm1 = vcmask 15360   ;;  %vm184_vm2 = vcmask 146432   ;;  %v186_v8 = vld [vmem:[%s649_s1] sm:$0xff] }
  0x14   : > { %410 = vmatprep.subr.mxu0 %v523_v0  ;;  %414 = vmatprep.mubr.msk.f32.mxu0 %vm525_vm0, %v523_v0  ;;  %vm194_vm3 = vcmask 1043456   ;;  %vm196_vm4 = vcmask 97280   ;;  %vm272_vm5 = vcmask 130048   ;;  %s461_s26 = scalar_lea.vmem %s309_s11, 128 }
  0x15   : > { %s399_s25 = sshll.u32 %s599_s24, 2  ;;  %p462_p11 = scmp.ne.s32.totalorder %s309_s11, %s461_s26 }
  0x16   : > { %s172_s28 = scalar_lea.vmem %s648_s0, %s399_s25  ;;  %s291_s25 = scalar_lea.sflag [#allocation3], %s160_s7 }
  0x17   : > { %v177_v1 = vld [vmem:[%s172_s28] sm:$0xf]  ;;  %p463_p12 = pnand %p462_p11, %p587_p5  ;;  %s465_s28 = sshll.u32 %s528_s27, 4  ;;  %s466_s28 = int_to_ptr.vmem [resolvable:$false] %s465_s28 }
  0x18   : > { %179 = vrot.lane.b32.xlu0 %v177_v1, %s524_s29  ;;  %s467_s29 = scalar_lea.vmem %s466_s28, 256  ;;  %p468_p0 = scmp.lt.s32.totalorder %s309_s11, %s466_s28 }
  0x19   : > { %p464_p13 = pneg %p463_p12  ;;  %p469_p1 = scmp.lt.s32.totalorder %s467_s29, %s461_s26 }
  0x1b   : > { %p470_p2 = por %p469_p1, %p468_p0 }
  0x1d   : > { %p471_p3 = pnand %p470_p2, %p464_p13 }
  0x8a   : > { %v180_v2 = vpop.permute.xlu0 %179 }
  0x8b   : > { %v183_v3 = vsel %vm182_vm1, 0.0, %v180_v2 }
  0x8c   : > { %v185_v4 = vsel %vm184_vm2, %v183_v3, 0.0 }
  0x8d   : > { %192 = vrot.lane.b32.xlu0 %v185_v4, %s526_s30  ;;  %v188_v5 = vrot.slane %v185_v4, 4 }
  0x8f   : > { %189 = vrot.lane.b32.xlu1 %v188_v5, %s527_s4 }
  0xff   : > { %v193_v6 = vpop.permute.xlu0 %192 }
 0x100   : > { %411 = vmatpush3.msk.msra.mxu0 %vm194_vm3, %v193_v6 }
 0x101   : > { %v190_v7 = vpop.permute.xlu1 %189  ;;  %412 = vmatprep.subr.mxu0 %v523_v0 }
 0x102   : > { %v195_v9 = vsel %vm194_vm3, %v185_v4, %v190_v7 }
 0x103   : > { %413 = vmatpush3.msra.mxu0 %v195_v9 }
 0x104   : > { %415 = vmatmul.mubr.msk.f32.vlgmr.msra.gmra.mxu0 %vm196_vm4, %v186_v8 }
 0x1c4   : > { %v268_v10 = vpop.f32.mrf.mxu0 }
 0x1c5   : > { %273 = vst.msk [vmem:[%s162_s9] sm:$0xff] %vm272_vm5, %v268_v10 }
 0x1c6   : > { %v416_v11 = vpop.f32.mrf.mxu0 }
 0x1cc   : > { %v274_v12 = vld [vmem:[%s162_s9] sm:$0xff] }
 0x1cd   : > { %v275_v13 = vsel %vm272_vm5, %v274_v12, 0.0 }
 0x1ce   : > { %276 = vadd.xlane.f32.xlu1 %v275_v13 }
 0x257   : > { %v277_v14 = vpop.xlane.xlu1 %276 }
 0x258   : > { %v280_v15 = vmul.f32 0.0625, %v277_v14 }
 0x25a   : > { %v281_v16 = vsub.f32 %v274_v12, %v280_v15 }
 0x25c   : > { %v282_v17 = vmul.f32 %v281_v16, %v281_v16 }
 0x25e   : > { %v283_v18 = vsel %vm272_vm5, %v282_v17, 0.0 }
 0x25f   : > { %284 = vadd.xlane.f32.xlu0 %v283_v18 }
 0x260   : > { %474 = shalt.err (!%p471_p3)
}
 0x261   : > { %s475_s16 = scalar_lea.hbm %s306_s20, 128  ;;  %s479_s5 = scalar_lea.hbm %s650_s2, 256 }
 0x262   : > { %p476_p4 = scmp.ne.s32.totalorder %s306_s20, %s475_s16  ;;  %p480_p9 = scmp.lt.s32.totalorder %s306_s20, %s650_s2 }
 0x263   : > { %p481_p10 = scmp.lt.s32.totalorder %s479_s5, %s475_s16 }
 0x264   : > { %p477_p7 = pnand %p476_p4, %p587_p5 }
 0x265   : > { %p482_p11 = por %p481_p10, %p480_p9 }
 0x266   : > { %p478_p8 = pneg %p477_p7 }
 0x268   : > { %p483_p12 = pnand %p482_p11, %p478_p8 }
 0x26a   : > { %486 = shalt.err (!%p483_p12)
}
 0x26b   : > { %417 = dma.vmem_to_hbm [thread:$0]  (%p587_p5), %s309_s11, 128, %s306_s20, %s291_s25   ;;  %vm287_vm6 = vcmask 7168  }
 0x26c   : > { %s400_s8 = sshll.u32 %s599_s24, 3 }
 0x26d   : > { %s176_s17 = scalar_lea.vmem %s651_s3, %s400_s8 }
 0x2e8   : > { %v285_v19 = vpop.xlane.xlu0 %284 }
 0x2e9   : > { %v288_v20 = vsel %vm287_vm6, %v277_v14, %v285_v19 }
 0x2ea   : > { %289 = vst.msk [vmem:[%s176_s17] sm:$0xff] %vm182_vm1, %v288_v20 }
 0x2eb PF: > { %p423_p13 = scmp.ge.s32.totalorder %s521_s15, 2  ;;  %s323_s19 = sand.u32 1, %s509_s12  }
 0x2ec   : > { %s324_s22 = scalar_lea.sflag [#allocation3], %s323_s19 }
 0x2ed   : > { %p420_p0 = pnand %p423_p13, %p591_p6 }
 0x2ef   : > { %p421_p1 = pneg %p420_p0 }
 0x2f1   : > { %504 = dma.done.wait (%p421_p1), %s324_s22, 128  }
 0x2f2   : > { %506 = vsyncadd (%p421_p1), %s324_s22, 4294967168  ;;  %p14_p5 = scmp.ge.s32.totalorder %s574_s18, 4   ;;  %s654_s12 = smov %s513_s13 }
 0x2f3   : > { %s655_s13 = smov %s517_s14  ;;  %s656_s14 = smov %s585_s21 }
 0x2f4   : > { %s657_s15 = smov %s574_s18  ;;  %16 = sbr.rel (!%p14_p5) target bundleno = 3 (0x3), region = 75 }
 0x2f9   :  { %336 = vsyncpa [#allocation3], 1 }
 0x2fa   :  { %338 = vsyncpa [#allocation3 + $0x1], 1 }

</bundles_post_ra>
